<compile_context>
chip_gen: v6e
topology: v6e:2x2x1
jax: 0.10.0
libtpu: 0.0.40
codegen_flags: <defaults>
</compile_context>

<pallas_src>
import functools

import jax
import jax.numpy as jnp
import numpy as np
from jax import lax
from jax.experimental import pallas as pl
from jax.experimental.pallas import tpu as pltpu


# ----------------------------------------------------------------------------
# Sizing helpers
# ----------------------------------------------------------------------------
def _round_up(x, m):
    return (x + m - 1) // m * m


def _physical_vmem_bytes():
    """Per-core VMEM capacity; conservative 64 MiB (v7x) if undetectable."""
    try:
        return int(pltpu.get_tpu_info().vmem_capacity_bytes)
    except Exception:
        return 64 << 20


def _vmem_limit_bytes(needed, physical):
    """Scoped-VMEM request: needed + pipeline headroom, never near physical."""
    limit = max(needed + (8 << 20), 32 << 20)
    return int(min(limit, physical - (4 << 20)))


def _choose_l_tile(L, C, itemsize, target_block_bytes=2 << 20):
    """L tile: multiple of 128, one (C, TL) block ~2 MiB, >=512 lanes if able."""
    if L <= 128:
        return int(L)                      # single full-length block
    Lp = _round_up(L, 128)
    tl = (target_block_bytes // max(C * itemsize, 1)) // 128 * 128
    tl = max(tl, 512)                      # >=512 lanes ~ 85% of HBM roofline
    tl = min(tl, Lp)
    return int(max(tl, 128))


# ----------------------------------------------------------------------------
# Fused single-pass kernel: pool + MLP + scale with x resident in a VMEM slab
# ----------------------------------------------------------------------------
def _se_fused_kernel(x_ref, w1_ref, b1_ref, w2_ref, b2_ref, o_ref,
                     slab_ref, acc_ref, gate_ref, *, L, TL, n_l):
    phase = pl.program_id(1)
    l = pl.program_id(2)

    @pl.when(jnp.logical_and(phase == 0, l == 0))
    def _():
        acc_ref[...] = jnp.zeros_like(acc_ref)

    @pl.when(phase == 0)
    def _():
        start = l * TL
        if TL % 128 == 0:
            start = pl.multiple_of(start, 128)
        tile = x_ref[0]                                    # (C, TL)
        slab_ref[:, pl.ds(start, TL)] = tile               # keep resident
        xf = tile.astype(jnp.float32)
        if L % TL != 0:                                    # mask tail padding
            lane = lax.broadcasted_iota(jnp.int32, xf.shape, 1)
            xf = jnp.where(lane + l * TL < L, xf, 0.0)
        acc_ref[...] += jnp.sum(xf, axis=-1, keepdims=True)

    @pl.when(jnp.logical_and(phase == 0, l == n_l - 1))
    def _():
        # Tiny per-batch MLP; runs once per batch so its cost is negligible
        # next to the DMA stream (the 128-lane broadcast keeps shapes in a
        # known-good MXU lowering).
        C = acc_ref.shape[0]
        mean = acc_ref[...] * (1.0 / L)                    # (C, 1)
        mean_b = jnp.broadcast_to(mean, (C, 128))          # (C, 128)
        h = jnp.dot(w1_ref[...], mean_b,
                    preferred_element_type=jnp.float32) + b1_ref[...]
        h = jnp.maximum(h, 0.0)                            # (mid, 128)
        z = jnp.dot(w2_ref[...], h,
                    preferred_element_type=jnp.float32) + b2_ref[...]
        gate_ref[...] = 1.0 / (1.0 + jnp.exp(-z[:, :1]))   # (C, 1)

    @pl.when(phase == 1)
    def _():
        start = l * TL
        if TL % 128 == 0:
            start = pl.multiple_of(start, 128)
        tile = slab_ref[:, pl.ds(start, TL)].astype(jnp.float32)
        o_ref[0] = (tile * gate_ref[...]).astype(o_ref.dtype)


def _se_fused(x, w1, b1, w2, b2, TL, vmem_limit):
    B, C, L = x.shape
    mid = w1.shape[0]
    n_l = (L + TL - 1) // TL
    Lp = n_l * TL

    kernel = functools.partial(_se_fused_kernel, L=L, TL=TL, n_l=n_l)
    return pl.pallas_call(
        kernel,
        out_shape=jax.ShapeDtypeStruct((B, C, L), x.dtype),
        grid=(B, 2, n_l),
        in_specs=[
            # phase 0: walk the L tiles; phase 1: park on the last tile (no DMA)
            pl.BlockSpec((1, C, TL),
                         lambda b, p, l: (b, 0, l * (1 - p) + (n_l - 1) * p)),
            pl.BlockSpec((mid, C), lambda b, p, l: (0, 0)),   # conv1 weight
            pl.BlockSpec((mid, 1), lambda b, p, l: (0, 0)),   # conv1 bias
            pl.BlockSpec((C, mid), lambda b, p, l: (0, 0)),   # conv2 weight
            pl.BlockSpec((C, 1), lambda b, p, l: (0, 0)),     # conv2 bias
        ],
        # phase 0 parks on output tile 0; it is written at phase 1, l=0 and
        # only flushed afterwards (standard revisit/accumulator semantics).
        out_specs=pl.BlockSpec((1, C, TL), lambda b, p, l: (b, 0, l * p)),
        scratch_shapes=[
            pltpu.VMEM((C, Lp), x.dtype),       # resident per-batch slab
            pltpu.VMEM((C, 1), jnp.float32),    # channel-sum accumulator
            pltpu.VMEM((C, 1), jnp.float32),    # gate
        ],
        compiler_params=pltpu.CompilerParams(
            dimension_semantics=("parallel", "arbitrary", "arbitrary"),
            vmem_limit_bytes=vmem_limit),
    )(x, w1, b1, w2, b2)


# ----------------------------------------------------------------------------
# Two-pass fallback (slab does not fit): pooled sums kernel + wrapper MLP +
# lane-dense apply kernel
# ----------------------------------------------------------------------------
def _se_pool_kernel(x_ref, sum_ref, acc_ref, *, L, TL):
    l = pl.program_id(1)

    @pl.when(l == 0)
    def _():
        acc_ref[...] = jnp.zeros_like(acc_ref)

    xf = x_ref[0].astype(jnp.float32)                       # (C, TL)
    if L % TL != 0:                                         # mask tail padding
        lane = lax.broadcasted_iota(jnp.int32, xf.shape, 1)
        xf = jnp.where(lane + l * TL < L, xf, 0.0)
    acc_ref[...] += jnp.sum(xf, axis=-1, keepdims=True)

    @pl.when(l == pl.num_programs(1) - 1)
    def _():
        sum_ref[0] = acc_ref[...]


def _se_apply_kernel(x_ref, gate_ref, o_ref):
    # out = x * gate, gate broadcast over the L tile (lane-dense store).
    o_ref[0] = (x_ref[0].astype(jnp.float32) * gate_ref[0]).astype(o_ref.dtype)


def _se_two_pass(x, w1, b1, w2, b2, TL, vmem_limit):
    B, C, L = x.shape
    n_l = (L + TL - 1) // TL

    sums = pl.pallas_call(
        functools.partial(_se_pool_kernel, L=L, TL=TL),
        out_shape=jax.ShapeDtypeStruct((B, C, 1), jnp.float32),
        grid=(B, n_l),
        in_specs=[pl.BlockSpec((1, C, TL), lambda b, l: (b, 0, l))],
        out_specs=pl.BlockSpec((1, C, 1), lambda b, l: (b, 0, 0)),
        scratch_shapes=[pltpu.VMEM((C, 1), jnp.float32)],
        compiler_params=pltpu.CompilerParams(
            dimension_semantics=("parallel", "arbitrary"),
            vmem_limit_bytes=vmem_limit),
    )(x)

    # Tiny MLP hoisted out of the pipelined loop and batched over B (plain XLA).
    mean = sums[:, :, 0] * (1.0 / L)                        # (B, C)
    h = jnp.maximum(mean @ w1.T + b1[:, 0], 0.0)            # (B, mid)
    z = h @ w2.T + b2[:, 0]                                 # (B, C)
    gate = (1.0 / (1.0 + jnp.exp(-z)))[:, :, None].astype(jnp.float32)

    out = pl.pallas_call(
        _se_apply_kernel,
        out_shape=jax.ShapeDtypeStruct((B, C, L), x.dtype),
        grid=(B, n_l),
        in_specs=[
            pl.BlockSpec((1, C, TL), lambda b, l: (b, 0, l)),
            pl.BlockSpec((1, C, 1), lambda b, l: (b, 0, 0)),
        ],
        out_specs=pl.BlockSpec((1, C, TL), lambda b, l: (b, 0, l)),
        compiler_params=pltpu.CompilerParams(
            dimension_semantics=("parallel", "parallel"),
            vmem_limit_bytes=vmem_limit),
    )(x, gate)
    return out


# ----------------------------------------------------------------------------
# Public entry point
# ----------------------------------------------------------------------------
@functools.partial(jax.jit, static_argnames=("l_tile", "force_two_pass"))
def se_forward(x, w1, b1, w2, b2, *, l_tile=None, force_two_pass=False):
    B, C, L = x.shape
    mid = w1.shape[0]
    isz = x.dtype.itemsize
    physical = _physical_vmem_bytes()

    TL = int(l_tile) if l_tile is not None else _choose_l_tile(L, C, isz)
    n_l = (L + TL - 1) // TL
    Lp = n_l * TL

    weight_bytes = 2 * 4 * (mid * C + mid + C * mid + C)    # double-buffered
    stream_bytes = 4 * C * TL * isz                         # 2x in + 2x out blk
    slab_bytes = C * Lp * isz
    fused_needed = slab_bytes + stream_bytes + weight_bytes + (1 << 20)

    # Fusion threshold: leave headroom for Mosaic internal scratch & pipeline
    # depth (48 MiB on v7x's 64 MiB VMEM, 96 MiB on v5e/v6e's 128 MiB).
    fused_budget = min(physical - (16 << 20), 96 << 20)

    if (not force_two_pass) and fused_needed <= fused_budget:
        return _se_fused(x, w1, b1, w2, b2, TL,
                         _vmem_limit_bytes(fused_needed, physical))
    return _se_two_pass(x, w1, b1, w2, b2, TL,
                        _vmem_limit_bytes(stream_bytes + (1 << 20), physical))


# ----------------------------------------------------------------------------
# Params + reference
# ----------------------------------------------------------------------------
def init_params(key, C):
    mid = max(C // 4, 8)  # SEModule.reduction == 4
    k1, k2, k3, k4 = jax.random.split(key, 4)
    w1 = jax.random.normal(k1, (mid, C), jnp.float32) * (1.0 / np.sqrt(C))
    b1 = jax.random.normal(k2, (mid, 1), jnp.float32) * 0.05
    w2 = jax.random.normal(k3, (C, mid), jnp.float32) * (1.0 / np.sqrt(mid))
    b2 = jax.random.normal(k4, (C, 1), jnp.float32) * 0.05
    return w1, b1, w2, b2


def se_reference_np(x, w1, b1, w2, b2):
    """float64 numpy reference mirroring the PyTorch SEModule forward."""
    x64 = np.asarray(x, dtype=np.float64)
    w1_, b1_, w2_, b2_ = (np.asarray(a, dtype=np.float64)
                          for a in (w1, b1, w2, b2))
    pooled = x64.mean(axis=-1, keepdims=True)                       # (B, C, 1)
    h = np.maximum(np.einsum('mc,bcl->bml', w1_, pooled) + b1_[None], 0.0)
    z = np.einsum('cm,bml->bcl', w2_, h) + b2_[None]
    g = 1.0 / (1.0 + np.exp(-z))                                    # (B, C, 1)
    return x64 * g


if __name__ == "__main__":
    # Small deterministic test: L = 640 with l_tile=256 -> 3 L tiles per batch
    # including a masked (partial) tail tile, exercising the cdiv tiling path.
    B, C, L = 2, 4, 640
    key = jax.random.PRNGKey(0)
    kx, kp = jax.random.split(key)
    x = jax.random.normal(kx, (B, C, L), jnp.float32)
    w1, b1, w2, b2 = init_params(kp, C)

    ref = se_reference_np(x, w1, b1, w2, b2)
    # Tolerance covers possible bf16 MXU truncation of the tiny f32 gate
    # matmuls (default matmul precision) in either kernel or XLA path.
    tol = dict(rtol=2e-3, atol=2e-3)

    # Fused single-pass path (default).
    out_fused = jax.block_until_ready(se_forward(x, w1, b1, w2, b2, l_tile=256))
    np.testing.assert_allclose(np.asarray(out_fused, dtype=np.float64), ref, **tol)

    # Two-pass fallback path (used when the per-batch slab exceeds the budget).
    out_two = jax.block_until_ready(
        se_forward(x, w1, b1, w2, b2, l_tile=256, force_two_pass=True))
    np.testing.assert_allclose(np.asarray(out_two, dtype=np.float64), ref, **tol)

    print("KERNEL_OK")
</pallas_src>

<mosaic_0001>
module attributes {stable_mosaic.version = 11 : i64} {
  func.func @_se_fused_kernel(%arg0: i32, %arg1: i32, %arg2: i32, %arg3: memref<1x4x256xf32, #tpu.memory_space<vmem>>, %arg4: memref<8x4xf32, #tpu.memory_space<vmem>>, %arg5: memref<8x1xf32, #tpu.memory_space<vmem>>, %arg6: memref<4x8xf32, #tpu.memory_space<vmem>>, %arg7: memref<4x1xf32, #tpu.memory_space<vmem>>, %arg8: memref<1x4x256xf32, #tpu.memory_space<vmem>>, %arg9: memref<4x768xf32, #tpu.memory_space<vmem>>, %arg10: memref<4x1xf32, #tpu.memory_space<vmem>>, %arg11: memref<4x1xf32, #tpu.memory_space<vmem>>) attributes {dimension_semantics = [#tpu.dimension_semantics<parallel>, #tpu.dimension_semantics<arbitrary>, #tpu.dimension_semantics<arbitrary>], iteration_bounds = array<i64: 2, 2, 3>, scalar_prefetch = 0 : i64, scratch_operands = 3 : i64, tpu.core_type = #tpu.core_type<tc>, window_params = [{transform_indices = @transform_0, window_bounds = array<i64: 1, 4, 256>}, {pipeline_mode = #tpu.pipeline_mode<synchronous>, transform_indices = @transform_1, window_bounds = array<i64: 8, 4>}, {pipeline_mode = #tpu.pipeline_mode<synchronous>, transform_indices = @transform_2, window_bounds = array<i64: 8, 1>}, {pipeline_mode = #tpu.pipeline_mode<synchronous>, transform_indices = @transform_3, window_bounds = array<i64: 4, 8>}, {pipeline_mode = #tpu.pipeline_mode<synchronous>, transform_indices = @transform_4, window_bounds = array<i64: 4, 1>}, {transform_indices = @transform_5, window_bounds = array<i64: 1, 4, 256>}]} {
    %c0_i32 = arith.constant 0 : i32
    %0 = arith.cmpi eq, %arg1, %c0_i32 : i32
    %c0_i32_0 = arith.constant 0 : i32
    %1 = arith.cmpi eq, %arg2, %c0_i32_0 : i32
    %2 = arith.andi %0, %1 : i1
    %3 = arith.extui %2 : i1 to i32
    %c0_i32_1 = arith.constant 0 : i32
    %4 = arith.cmpi ne, %3, %c0_i32_1 : i32
    scf.if %4 {
      %cst = arith.constant 0.000000e+00 : f32
      %16 = vector.broadcast %cst : f32 to vector<4x1xf32>
      %c0 = arith.constant 0 : index
      %c0_7 = arith.constant 0 : index
      %17 = vector.load %arg10[%c0, %c0_7] : memref<4x1xf32, #tpu.memory_space<vmem>>, vector<4x1xf32>
      tpu.vector_store %arg10[%c0, %c0_7], %16 {strides = array<i32>} : memref<4x1xf32, #tpu.memory_space<vmem>>, vector<4x1xf32>,
    } else {
    }
    %c0_i32_2 = arith.constant 0 : i32
    %5 = arith.cmpi eq, %arg1, %c0_i32_2 : i32
    %6 = arith.extui %5 : i1 to i32
    %c0_i32_3 = arith.constant 0 : i32
    %7 = arith.cmpi ne, %6, %c0_i32_3 : i32
    scf.if %7 {
      %c256_i32 = arith.constant 256 : i32
      %16 = arith.muli %arg2, %c256_i32 : i32
      %17 = tpu.assume_multiple %16, 128 : i32
      %c0 = arith.constant 0 : index
      %c0_7 = arith.constant 0 : index
      %c0_8 = arith.constant 0 : index
      %18 = vector.load %arg3[%c0, %c0_7, %c0_8] : memref<1x4x256xf32, #tpu.memory_space<vmem>>, vector<1x4x256xf32>
      %19 = vector.shape_cast %18 : vector<1x4x256xf32> to vector<4x256xf32>
      %c0_9 = arith.constant 0 : index
      %20 = arith.index_cast %17 : i32 to index
      %21 = vector.load %arg9[%c0_9, %20] : memref<4x768xf32, #tpu.memory_space<vmem>>, vector<4x256xf32>
      tpu.vector_store %arg9[%c0_9, %20], %19 {strides = array<i32>} : memref<4x768xf32, #tpu.memory_space<vmem>>, vector<4x256xf32>,
      %22 = tpu.iota {dimensions = array<i32: 1>} : vector<4x256xi32>
      %c256_i32_10 = arith.constant 256 : i32
      %23 = arith.muli %arg2, %c256_i32_10 : i32
      %24 = vector.broadcast %23 : i32 to vector<4x256xi32>
      %25 = arith.addi %22, %24 : vector<4x256xi32>
      %c640_i32 = arith.constant 640 : i32
      %26 = vector.broadcast %c640_i32 : i32 to vector<4x256xi32>
      %27 = arith.cmpi slt, %25, %26 : vector<4x256xi32>
      %cst = arith.constant 0.000000e+00 : f32
      %28 = vector.broadcast %cst : f32 to vector<4x256xf32>
      %29 = arith.select %27, %19, %28 : vector<4x256xi1>, vector<4x256xf32>
      %c0_11 = arith.constant 0 : index
      %c0_12 = arith.constant 0 : index
      %30 = vector.load %arg10[%c0_11, %c0_12] : memref<4x1xf32, #tpu.memory_space<vmem>>, vector<4x1xf32>
      %cst_13 = arith.constant dense<0.000000e+00> : vector<4xf32>
      %31 = vector.multi_reduction <add>, %29, %cst_13 [1] : vector<4x256xf32> to vector<4xf32>
      %32 = vector.shape_cast %31 : vector<4xf32> to vector<4x1xf32>
      %33 = arith.addf %30, %32 : vector<4x1xf32>
      %c0_14 = arith.constant 0 : index
      %c0_15 = arith.constant 0 : index
      %34 = vector.load %arg10[%c0_14, %c0_15] : memref<4x1xf32, #tpu.memory_space<vmem>>, vector<4x1xf32>
      tpu.vector_store %arg10[%c0_14, %c0_15], %33 {strides = array<i32>} : memref<4x1xf32, #tpu.memory_space<vmem>>, vector<4x1xf32>,
    } else {
    }
    %c0_i32_4 = arith.constant 0 : i32
    %8 = arith.cmpi eq, %arg1, %c0_i32_4 : i32
    %c2_i32 = arith.constant 2 : i32
    %9 = arith.cmpi eq, %arg2, %c2_i32 : i32
    %10 = arith.andi %8, %9 : i1
    %11 = arith.extui %10 : i1 to i32
    %c0_i32_5 = arith.constant 0 : i32
    %12 = arith.cmpi ne, %11, %c0_i32_5 : i32
    scf.if %12 {
      %c0 = arith.constant 0 : index
      %c0_7 = arith.constant 0 : index
      %16 = vector.load %arg10[%c0, %c0_7] : memref<4x1xf32, #tpu.memory_space<vmem>>, vector<4x1xf32>
      %cst = arith.constant 1.562500e-03 : f32
      %17 = vector.broadcast %cst : f32 to vector<4x1xf32>
      %18 = arith.mulf %16, %17 : vector<4x1xf32>
      %19 = vector.shape_cast %18 : vector<4x1xf32> to vector<4x1xf32>
      %20 = vector.broadcast %19 : vector<4x1xf32> to vector<4x128xf32>
      %c0_8 = arith.constant 0 : index
      %c0_9 = arith.constant 0 : index
      %21 = vector.load %arg4[%c0_8, %c0_9] : memref<8x4xf32, #tpu.memory_space<vmem>>, vector<8x4xf32>
      %cst_10 = arith.constant dense<0.000000e+00> : vector<8x128xf32>
      %22 = tpu.matmul %21, %20, %cst_10 {dimension_numbers = #tpu.dot_dimension_numbers<[1], [0], [0], [1], [0, 0, 1, 1], [], []>} : vector<8x4xf32>, vector<4x128xf32>, vector<8x128xf32> -> vector<8x128xf32>
      %c0_11 = arith.constant 0 : index
      %c0_12 = arith.constant 0 : index
      %23 = vector.load %arg5[%c0_11, %c0_12] : memref<8x1xf32, #tpu.memory_space<vmem>>, vector<8x1xf32>
      %24 = vector.broadcast %23 : vector<8x1xf32> to vector<8x128xf32>
      %25 = arith.addf %22, %24 : vector<8x128xf32>
      %cst_13 = arith.constant 0.000000e+00 : f32
      %26 = vector.broadcast %cst_13 : f32 to vector<8x128xf32>
      %27 = arith.maximumf %25, %26 : vector<8x128xf32>
      %c0_14 = arith.constant 0 : index
      %c0_15 = arith.constant 0 : index
      %28 = vector.load %arg6[%c0_14, %c0_15] : memref<4x8xf32, #tpu.memory_space<vmem>>, vector<4x8xf32>
      %cst_16 = arith.constant dense<0.000000e+00> : vector<4x128xf32>
      %29 = tpu.matmul %28, %27, %cst_16 {dimension_numbers = #tpu.dot_dimension_numbers<[1], [0], [0], [1], [0, 0, 1, 1], [], []>} : vector<4x8xf32>, vector<8x128xf32>, vector<4x128xf32> -> vector<4x128xf32>
      %c0_17 = arith.constant 0 : index
      %c0_18 = arith.constant 0 : index
      %30 = vector.load %arg7[%c0_17, %c0_18] : memref<4x1xf32, #tpu.memory_space<vmem>>, vector<4x1xf32>
      %31 = vector.broadcast %30 : vector<4x1xf32> to vector<4x128xf32>
      %32 = arith.addf %29, %31 : vector<4x128xf32>
      %33 = vector.extract_strided_slice %32 {offsets = [0, 0], sizes = [4, 1], strides = [1, 1]} : vector<4x128xf32> to vector<4x1xf32>
      %cst_19 = arith.constant 0.000000e+00 : f32
      %34 = vector.broadcast %cst_19 : f32 to vector<4x1xf32>
      %35 = arith.subf %34, %33 : vector<4x1xf32>
      %36 = math.exp %35 : vector<4x1xf32>
      %cst_20 = arith.constant 1.000000e+00 : f32
      %37 = vector.broadcast %cst_20 : f32 to vector<4x1xf32>
      %38 = arith.addf %37, %36 : vector<4x1xf32>
      %cst_21 = arith.constant 1.000000e+00 : f32
      %39 = vector.broadcast %cst_21 : f32 to vector<4x1xf32>
      %40 = arith.divf %39, %38 : vector<4x1xf32>
      %c0_22 = arith.constant 0 : index
      %c0_23 = arith.constant 0 : index
      %41 = vector.load %arg11[%c0_22, %c0_23] : memref<4x1xf32, #tpu.memory_space<vmem>>, vector<4x1xf32>
      tpu.vector_store %arg11[%c0_22, %c0_23], %40 {strides = array<i32>} : memref<4x1xf32, #tpu.memory_space<vmem>>, vector<4x1xf32>,
    } else {
    }
    %c1_i32 = arith.constant 1 : i32
    %13 = arith.cmpi eq, %arg1, %c1_i32 : i32
    %14 = arith.extui %13 : i1 to i32
    %c0_i32_6 = arith.constant 0 : i32
    %15 = arith.cmpi ne, %14, %c0_i32_6 : i32
    scf.if %15 {
      %c256_i32 = arith.constant 256 : i32
      %16 = arith.muli %arg2, %c256_i32 : i32
      %17 = tpu.assume_multiple %16, 128 : i32
      %c0 = arith.constant 0 : index
      %18 = arith.index_cast %17 : i32 to index
      %19 = vector.load %arg9[%c0, %18] : memref<4x768xf32, #tpu.memory_space<vmem>>, vector<4x256xf32>
      %c0_7 = arith.constant 0 : index
      %c0_8 = arith.constant 0 : index
      %20 = vector.load %arg11[%c0_7, %c0_8] : memref<4x1xf32, #tpu.memory_space<vmem>>, vector<4x1xf32>
      %21 = vector.broadcast %20 : vector<4x1xf32> to vector<4x256xf32>
      %22 = arith.mulf %19, %21 : vector<4x256xf32>
      %c0_9 = arith.constant 0 : index
      %c0_10 = arith.constant 0 : index
      %c0_11 = arith.constant 0 : index
      %23 = vector.load %arg8[%c0_9, %c0_10, %c0_11] : memref<1x4x256xf32, #tpu.memory_space<vmem>>, vector<1x4x256xf32>
      %24 = vector.shape_cast %23 : vector<1x4x256xf32> to vector<4x256xf32>
      %25 = vector.shape_cast %22 : vector<4x256xf32> to vector<1x4x256xf32>
      tpu.vector_store %arg8[%c0_9, %c0_10, %c0_11], %25 {strides = array<i32>} : memref<1x4x256xf32, #tpu.memory_space<vmem>>, vector<1x4x256xf32>,
    } else {
    }
    return
  }
  func.func @transform_0(%arg0: i32, %arg1: i32, %arg2: i32) -> (i32, i32, i32) {
    %c1_i32 = arith.constant 1 : i32
    %0 = arith.subi %c1_i32, %arg1 : i32
    %1 = arith.muli %arg2, %0 : i32
    %c2_i32 = arith.constant 2 : i32
    %2 = arith.muli %c2_i32, %arg1 : i32
    %3 = arith.addi %1, %2 : i32
    %c0_i32 = arith.constant 0 : i32
    %c0_i32_0 = arith.constant 0 : i32
    return %arg0, %c0_i32, %3 : i32, i32, i32
  }
  func.func @transform_1(%arg0: i32, %arg1: i32, %arg2: i32) -> (i32, i32) {
    %c0_i32 = arith.constant 0 : i32
    %c0_i32_0 = arith.constant 0 : i32
    %c0_i32_1 = arith.constant 0 : i32
    return %c0_i32, %c0_i32_0 : i32, i32
  }
  func.func @transform_2(%arg0: i32, %arg1: i32, %arg2: i32) -> (i32, i32) {
    %c0_i32 = arith.constant 0 : i32
    %c0_i32_0 = arith.constant 0 : i32
    %c0_i32_1 = arith.constant 0 : i32
    return %c0_i32, %c0_i32_0 : i32, i32
  }
  func.func @transform_3(%arg0: i32, %arg1: i32, %arg2: i32) -> (i32, i32) {
    %c0_i32 = arith.constant 0 : i32
    %c0_i32_0 = arith.constant 0 : i32
    %c0_i32_1 = arith.constant 0 : i32
    return %c0_i32, %c0_i32_0 : i32, i32
  }
  func.func @transform_4(%arg0: i32, %arg1: i32, %arg2: i32) -> (i32, i32) {
    %c0_i32 = arith.constant 0 : i32
    %c0_i32_0 = arith.constant 0 : i32
    %c0_i32_1 = arith.constant 0 : i32
    return %c0_i32, %c0_i32_0 : i32, i32
  }
  func.func @transform_5(%arg0: i32, %arg1: i32, %arg2: i32) -> (i32, i32, i32) {
    %0 = arith.muli %arg2, %arg1 : i32
    %c0_i32 = arith.constant 0 : i32
    %c0_i32_0 = arith.constant 0 : i32
    return %arg0, %c0_i32, %0 : i32, i32, i32
  }
}

</mosaic_0001>

<bundles_post_ra>
// kernel: se_forward.1
= control target key start
LH: loop header
LB: loop body
LE: loop exit
PB: predicated region body
PF: predicated region fallthrough
CT: control target
= control target key end

     0   :  { %s1336_s0 = inlined_call_operand.hbm [shape: f32[2,4,640], index: 0, kind: input, shape index: {}]   ;;  %s1337_s1 = inlined_call_operand.vmem [shape: f32[8,4], index: 1, kind: input, shape index: {}]   ;;  %s1338_s2 = inlined_call_operand.vmem [shape: f32[8,1], index: 2, kind: input, shape index: {}]   ;;  %s1339_s3 = inlined_call_operand.vmem [shape: f32[4,8], index: 3, kind: input, shape index: {}]   ;;  %s1340_s4 = inlined_call_operand.vmem [shape: f32[4,1], index: 4, kind: input, shape index: {}]   ;;  %s1341_s5 = inlined_call_operand.hbm [shape: f32[2,4,640], index: 5, kind: output, shape index: {}]  }
   0x1   :  { %1348 = sst [smem:[#allocation17_spill]] %s1337_s1 }
   0x2   :  { %1349 = sst [smem:[#allocation18_spill]] %s1339_s3 }
   0x3   :  { %1350 = sst [smem:[#allocation19_spill]] %s1340_s4 }
   0x4   :  { %1351 = sst [smem:[#allocation20_spill]] %s1341_s5 }
   0x5   :  { %10 = vsyncpa [#allocation6], 0 }
   0x6   :  { %12 = vsyncpa [#allocation6 + $0x1], 0 }
   0x7   :  { %13 = vsyncpa [#allocation7], 0 }
   0x8   :  { %15 = vsyncpa [#allocation7 + $0x1], 0  ;;  %s1053_s18 = smov 0   ;;  %s1055_s19 = smov 0  }
   0x9   :  { %s1057_s20 = smov 0   ;;  %s1059_s21 = smov 0  }
   0xa   :  { %s1061_s22 = smov 0   ;;  %s1063_s23 = smov 0  }
   0xb   :  { %s1065_s24 = smov 0   ;;  %s1067_s25 = smov 0  }
   0xc   :  { %s1069_s26 = smov 0   ;;  %s1071_s27 = smov 0  }
   0xd   :  { %s1073_s28 = smov 0   ;;  %s1075_s29 = smov 0  }
   0xe   :  { %s1077_s30 = smov 0  }
   0xf LB: > { %1352 = sst [smem:[#allocation11_spill]] %s997_s26  ;;  %s675_s6 = sadd.s32 4294967295, %s1013_s30   ;;  %s1013_s30 = sphi %s1077_s30, %s21_s30   ;;  %s1009_s29 = sphi %s1075_s29, %s1383_s29   ;;  %s1005_s28 = sphi %s1073_s28, %s1372_s28   ;;  %s1001_s27 = sphi %s1071_s27, %s1371_s27   ;;  %s997_s26 = sphi %s1069_s26, %s1382_s26   ;;  %s993_s25 = sphi %s1067_s25, %s1381_s25   ;;  %s989_s24 = sphi %s1065_s24, %s1369_s24   ;;  %s985_s23 = sphi %s1063_s23, %s1380_s23   ;;  %s981_s22 = sphi %s1061_s22, %s1379_s22   ;;  %s977_s21 = sphi %s1059_s21, %s1378_s21   ;;  %s973_s20 = sphi %s1057_s20, %s1377_s20   ;;  %s969_s19 = sphi %s1055_s19, %s1376_s19   ;;  %s965_s18 = sphi %s1053_s18, %s1375_s18  }
  0x10   : > { %1353 = sst [smem:[#allocation12_spill]] %s1001_s27  ;;  %s33_s8 = sadd.s32 1, %s1001_s27 }
  0x11   : > { %1354 = sst [smem:[#allocation13_spill]] %s1005_s28  ;;  %s36_s9 = sadd.s32 1, %s1005_s28 }
  0x12   : > { %p34_p0 = scmp.ge.s32.totalorder %s33_s8, 3  ;;  %s40_s10 = sadd.s32 1, %s1009_s29 }
  0x13   : > { %s44_s11 = ssub.s32 1, %s1005_s28  ;;  %s677_s12 = sshll.u32 %s1005_s28, 1 }
  0x14   : > { %s1385_s8 = smov (%p34_p0, %s33_s8), 0  ;;  %s1387_s9 = smov (!%p34_p0, %s36_s9), %s1005_s28 }
  0x15   : > { %1355 = sst [smem:[#allocation14_spill]] %s1385_s8  ;;  %s45_s13 = smul.u32 %s1001_s27, %s44_s11 }
  0x16   : > { %s57_s14 = sadd.s32 1, %s985_s23  ;;  %p38_p1 = scmp.ge.s32.totalorder %s1387_s9, 2 }
  0x17   : > { %p64_p2 = scmp.ne.s32.totalorder %s985_s23, %s981_s22  ;;  %s1132_s15 = sadd.s32 %s677_s12, %s45_s13 }
  0x18   : > { %p65_p3 = scmp.eq.s32.totalorder %s1013_s30, 0  ;;  %s1389_s9 = smov (%p38_p1, %s1387_s9), 0 }
  0x19   : > { %1356 = sst [smem:[#allocation15_spill]] %s1389_s9  ;;  %s1391_s10 = smov (!%p38_p1, %s40_s10), %s1009_s29 }
  0x1a   : > { %s48_s16 = ssub.s32 1, %s1389_s9  ;;  %s678_s17 = sshll.u32 %s1389_s9, 1 }
  0x1b   : > { %p42_p4 = scmp.ge.s32.totalorder %s1391_s10, 2  ;;  %s49_s11 = smul.u32 %s48_s16, %s1385_s8 }
  0x1c   : > { %p1141_p5 = por %p65_p3, %p64_p2  ;;  %p70_p6 = scmp.ne.s32.totalorder %s981_s22, %s977_s21 }
  0x1d   : > { %s1393_s10 = smov (%p42_p4, %s1391_s10), 0  ;;  %s51_s13 = sadd.s32 %s678_s17, %s49_s11 }
  0x1e   : > { %1358 = sst [smem:[#allocation16_spill]] %s1393_s10  ;;  %p71_p7 = scmp.eq.s32.totalorder %s675_s6, 0 }
  0x1f   : > { %s52_s7 = ssub.s32 %s1009_s29, %s1393_s10  ;;  %s53_s5 = ssub.s32 %s1132_s15, %s51_s13 }
  0x20   : > { %s54_s16 = sor.u32 %s53_s5, %s52_s7  ;;  %p1154_p8 = por %p71_p7, %p70_p6 }
  0x21   : > { %p55_p9 = scmp.eq.s32.totalorder %s54_s16, 0  ;;  %s164_s21 = smul.u32 %s1001_s27, %s1005_s28 }
  0x22   : > { %s165_s3 = smul.u32 %s1389_s9, %s1385_s8  ;;  %s171_s4 = sadd.s32 1, %s973_s20 }
  0x23   : > { %s1164_s1 = scalar_select %p55_p9, %s985_s23, %s57_s14  }
  0x24   : > { %s167_s17 = ssub.s32 %s164_s21, %s165_s3  ;;  %p181_p10 = scmp.ne.s32.totalorder %s973_s20, %s969_s19 }
  0x25   : > { %s168_s11 = sor.u32 %s167_s17, %s52_s7  ;;  %p182_p11 = scmp.eq.s32.totalorder %s675_s6, 11 }
  0x26   : > { %p169_p12 = scmp.eq.s32.totalorder %s168_s11, 0  ;;  %p187_p13 = scmp.ne.s32.totalorder %s969_s19, %s965_s18 }
  0x27   : > { %p1172_p0 = por %p182_p11, %p181_p10  ;;  %s1361_s5 = sadd.s32 4294967294, %s1013_s30  }
  0x28   : > { %p188_p1 = scmp.eq.s32.totalorder %s1361_s5, 11  ;;  %p680_p3 = scmp.ge.s32.totalorder %s1013_s30, 12 }
  0x29   : > { %s1179_s10 = scalar_select %p169_p12, %s973_s20, %s171_s4  }
  0x2a   : > { %p1181_p2 = por %p188_p1, %p187_p13  ;;  %216 = sbr.rel (%p680_p3) target bundleno = 81 (0x51), region = 32 }
  0x2f   : > { %219 = sbr.rel (!%p1141_p5) target bundleno = 81 (0x51), region = 36  ;;  %s220_s3 = sand.u32 (%p1141_p5), 1, %s985_s23  }
  0x30   : > { %s683_s6 = sshll.u32 (%p1141_p5), %s1132_s15, 1  ;;  %s681_s7 = sshll.u32 (%p1141_p5), %s220_s3, 3 }
  0x31   : > { %s230_s14 = ssub.s32 (%p1141_p5), 5, %s683_s6  ;;  %s1193_s17 = scalar_lea.sflag (%p1141_p5), [#allocation6], %s220_s3 }
  0x32   : > { %p231_p4 = scmp.lt.s32.totalorder (%p1141_p5), %s230_s14, 2  ;;  %s224_s11 = scalar_lea.vmem (%p1141_p5), [#allocation5], %s681_s7 }
  0x34   : > { %s1395_s14 = smov (!%p231_p4, %s230_s14), 2 }
  0x35   : > { %s1190_s4 = sshll.u32 %s1395_s14, 6 }
  0x36   : > { %s235_s21 = ssub.s32 128, %s1190_s4 }
  0x37   : > { %236 = vsyncadd %s1193_s17, %s235_s21  ;;  %s724_s12 = smul.u32 5, %s1009_s29  ;;  %p685_p5 = scmp.ne.s32.totalorder %s1190_s4, 0 }
  0x38   : > { %s244_s15 = sshll.u32 %s224_s11, 4  ;;  %s855_s21 = scalar_lea.hbm %s1336_s0, 640  ;;  %s245_s15 = int_to_ptr.vmem [resolvable:$true] %s244_s15 }
  0x39   : > { %s239_s5 = sadd.s32 %s724_s12, %s683_s6 }
  0x3a   : > { %s686_s9 = sshll.u32 %s239_s5, 6 }
  0x3b   : > { %s241_s28 = scalar_lea.hbm %s1336_s0, %s686_s9 }
  0x3c   : > { %s851_s27 = scalar_lea.hbm %s241_s28, %s1190_s4 }
  0x3d   : > { %p852_p6 = scmp.ne.s32.totalorder %s241_s28, %s851_s27  ;;  %p857_p10 = scmp.lt.s32.totalorder %s855_s21, %s851_s27 }
  0x3f   : > { %p853_p7 = pnand %p852_p6, %p685_p5 }
  0x41   : > { %p854_p9 = pneg %p853_p7 }
  0x43   : > { %p859_p11 = pnand %p857_p10, %p854_p9 }
  0x45   : > { %862 = shalt.err (!%p859_p11)
}
  0x46   : > { %s863_s6 = scalar_lea.vmem %s245_s15, %s1190_s4  ;;  %s1015_s8 = smov [#allocation5]  }
  0x47   : > { %p864_p12 = scmp.ne.s32.totalorder %s245_s15, %s863_s6  ;;  %s867_s9 = sshll.u32 %s1015_s8, 4  ;;  %s868_s9 = int_to_ptr.vmem [resolvable:$false] %s867_s9 }
  0x48   : > { %s869_s11 = scalar_lea.vmem %s868_s9, 256  ;;  %p870_p3 = scmp.lt.s32.totalorder %s245_s15, %s868_s9 }
  0x49   : > { %p865_p13 = pnand %p864_p12, %p685_p5  ;;  %p871_p4 = scmp.lt.s32.totalorder %s869_s11, %s863_s6 }
  0x4b   : > { %p866_p1 = pneg %p865_p13  ;;  %p872_p6 = por %p871_p4, %p870_p3 }
  0x4d   : > { %p873_p7 = pnand %p872_p6, %p866_p1 }
  0x4f   : > { %876 = shalt.err (!%p873_p7)
}
  0x50   : > { %247 = dma.hbm_to_vmem [thread:$0]  (%p685_p5), %s241_s28, %s1190_s4, %s245_s15, %s1193_s17  }
  0x51 PF: > { %p689_p9 = scmp.ge.s32.totalorder %s1013_s30, 1  ;;  %p249_p10 = scmp.lt.s32.totalorder %s1013_s30, 13 }
  0x53   : > { %p250_p11 = pnand %p689_p9, %p249_p10 }
  0x54   : > { %s255_s27 = sand.u32 (!%p250_p11), 1, %s981_s22  }
  0x55   : > { %253 = sbr.rel (%p250_p11) target bundleno = 1000 (0x3e8), region = 40  ;;  %s690_s12 = sshll.u32 (!%p250_p11), %s255_s27, 3 }
  0x56   : > { %s256_s5 = scalar_lea.sflag (!%p250_p11), [#allocation6], %s255_s27  ;;  %s259_s14 = scalar_lea.vmem (!%p250_p11), [#allocation5], %s690_s12 }
  0x5a   : > { %956 = dma.done.wait (%p1154_p8), %s256_s5, 128  }
  0x5b   : > { %958 = vsyncadd (%p1154_p8), %s256_s5, 4294967168  ;;  %s283_s28 = sand.u32 1, %s969_s19   ;;  %p301_p5 = scmp.eq.s32.totalorder %s993_s25, 0 }
  0x5c   : > { %s1225_s4 = sshll.u32 %s283_s28, 3  ;;  %p302_p12 = scmp.eq.s32.totalorder %s989_s24, 0 }
  0x5d   : > { %s285_s17 = scalar_lea.vmem [#allocation8], %s1225_s4 }
  0x5e   : > { %p303_p13 = pnand %p302_p12, %p301_p5 }
  0x60   : > { %306 = sbr.rel (%p303_p13) target bundleno = 103 (0x67), region = 48 }
  0x65   : > { %vm307_vm0 = vcmask 3072   ;;  %v1016_v0 = vmov 0.0  }
  0x66   : > { %308 = vst.msk [vmem:[#allocation3] sm:$0xf] %vm307_vm0, %v1016_v0 }
  0x67 PF: > { %p692_p8 = scmp.ne.s32.totalorder %s993_s25, 0 }
  0x68   : > { %s693_s26 = sshll.u32 (!%p692_p8), %s989_s24, 8 }
  0x69   : > { %311 = sbr.rel (%p692_p8) target bundleno = 264 (0x108), region = 52  ;;  %s314_s15 = sshra.s32 (!%p692_p8), %s693_s26, 7 }
  0x6a   : > { %s694_s3 = sshll.u32 (!%p692_p8), %s314_s15, 2 }
  0x6b   : > { %s317_s7 = scalar_lea.vmem (!%p692_p8), [#allocation2], %s694_s3 }
  0x6e   : > { %v319_v1 = vlaneseq  ;;  %v322_v2 = vstv %s693_s26  ;;  %v313_v3 = vld [vmem:[%s259_s14] sm:$0xff]  ;;  %vm333_vm1 = vcmask 1043456   ;;  %v332_v14 = vld [vmem:[#allocation3] sm:$0xf]  ;;  %vm340_vm4 = vcmask 3072  }
  0x6f   : > { %318 = vst [vmem:[%s317_s7] sm:$0xff] %v313_v3  ;;  %v328_v7 = vcombine.high %v313_v3, %v313_v3 }
  0x70   : > { %v320_v4 = vand.u32 127, %v319_v1 }
  0x72   : > { %v321_v5 = vadd.s32 128, %v320_v4  ;;  %v323_v6 = vadd.s32 %v322_v2, %v320_v4 }
  0x74   : > { %v324_v8 = vadd.s32 %v322_v2, %v321_v5  ;;  %vm325_vm2 = vcmp.lt.s32.totalorder %v323_v6, 640 }
  0x75   : > { %v330_v9 = vsel %vm325_vm2, %v313_v3, 0.0 }
  0x76   : > { %vm326_vm3 = vcmp.lt.s32.totalorder %v324_v8, 640  ;;  %v334_v10 = vsel %vm333_vm1, %v330_v9, 0.0 }
  0x77   : > { %v331_v11 = vsel %vm326_vm3, %v328_v7, 0.0 }
  0x78   : > { %v335_v12 = vsel %vm333_vm1, %v331_v11, 0.0 }
  0x79   : > { %v336_v13 = vadd.f32 %v335_v12, %v334_v10 }
  0x7b   : > { %337 = vadd.xlane.f32.xlu0 %v336_v13 }
 0x104   : > { %v338_v15 = vpop.xlane.xlu0 %337 }
 0x105   : > { %v339_v16 = vadd.f32 %v338_v15, %v332_v14 }
 0x107   : > { %341 = vst.msk [vmem:[#allocation3] sm:$0xf] %vm340_vm4, %v339_v16 }
 0x108 PF: > { %p342_p1 = scmp.eq.s32.totalorder %s989_s24, 2 }
 0x10a   : > { %p343_p3 = pnand %p342_p1, %p301_p5 }
 0x10b   : > { %s1363_s11 = sld [smem:[#allocation17_spill]] (!%p343_p3) }
 0x10c   : > { %346 = sbr.rel (%p343_p3) target bundleno = 829 (0x33d), region = 56  ;;  %s1364_s5 = sld [smem:[#allocation19_spill]] (!%p343_p3) }
 0x10d   : > { %s1365_s15 = sld [smem:[#allocation18_spill]] (!%p343_p3) }
 0x111   : > { %v347_v17 = vld [vmem:[#allocation3] sm:$0xf]  ;;  %v1017_v18 = vmov 0   ;;  %v1018_v20 = vmov 0.0   ;;  %vm1019_vm5 = vmmov 0   ;;  %v354_v21 = vld [vmem:[%s1338_s2] sm:$0xff] }
 0x112   : > { %844 = vset.pattern.permute.xlu0 %v1017_v18  ;;  %v348_v19 = vmul.f32 0.0015625, %v347_v17  ;;  %714 = vmatprep.subr.mxu0 %v1018_v20  ;;  %vm364_vm6 = vcmask 1043456   ;;  %v353_v22 = vld [vmem:[%s1363_s11] sm:$0xff]  ;;  %vm360_vm7 = vcmask 31744   ;;  %vm445_vm8 = vcmask 64512  }
 0x113   : > { %716 = vmatprep.mubr.msk.f32.mxu0 %vm1019_vm5, %v1018_v20  ;;  %719 = vmatprep.subr.mxu1 %v1018_v20  ;;  %v439_v24 = vld [vmem:[%s1364_s5] sm:$0xf]  ;;  %vm525_vm9 = vcmask 3072  }
 0x114   : > { %351 = vperm.xlu0 %844, %v348_v19   ;;  %721 = vmatprep.mubr.msk.f32.mxu1 %vm1019_vm5, %v1018_v20  ;;  %v438_v30 = vld [vmem:[%s1365_s15] sm:$0xf] }
 0x115   : > { %845 = vset.pattern.permute.xlu1 %v1017_v18 }
 0x116   : > { %442 = vperm.xlu1 %845, %v439_v24  }
 0x118   : > { %357 = vperm.xlu0 %844, %v354_v21  }
 0x18f   : > { %v352_v23 = vpop.permute.xlu0 %351 }
 0x190   : > { %715 = vmatpush3.msk.msra.mxu0 %vm364_vm6, %v352_v23 }
 0x191   : > { %717 = vmatmul.mubr.msk.f32.vlgmr.msra.gmra.mxu0 %vm360_vm7, %v353_v22  ;;  %v443_v31 = vpop.permute.xlu1 %442 }
 0x193   : > { %v358_v25 = vpop.permute.xlu0 %357 }
 0x251   : > { %v433_v26 = vpop.f32.mrf.mxu0 }
 0x252   : > { %v434_v27 = vadd.f32 %v433_v26, %v358_v25 }
 0x253   : > { %v718_v28 = vpop.f32.mrf.mxu0 }
 0x254   : > { %v437_v29 = vmax.f32 %v434_v27, 0.0 }
 0x256   : > { %720 = vmatpush3.msra.mxu1 %v437_v29 }
 0x257   : > { %722 = vmatmul.mubr.msk.f32.vlgmr.msra.gmra.mxu1 %vm445_vm8, %v438_v30 }
 0x317   : > { %v515_v32 = vpop.f32.mrf.mxu1 }
 0x318   : > { %v516_v33 = vadd.f32 %v515_v32, %v443_v31 }
 0x319   : > { %v723_v34 = vpop.f32.mrf.mxu1 }
 0x31a   : > { %v519_v35 = vsub.f32 0.0, %v516_v33 }
 0x31c   : > { %v520_v36 = vmul.f32 1.442695, %v519_v35 }
 0x31e   : > { %846 = vpow2.f32 %v520_v36 }
 0x32b   : > { %v847_v37 = vpop.eup %846 }
 0x32c   : > { %v522_v38 = vadd.f32 1.0, %v847_v37 }
 0x32e   : > { %848 = vrcp.f32 %v522_v38 }
 0x33b   : > { %v849_v39 = vpop.eup %848 }
 0x33c   : > { %526 = vst.msk [vmem:[#allocation4] sm:$0xf] %vm525_vm9, %v849_v39 }
 0x33d PF: > { %p698_p4 = scmp.ne.s32.totalorder %s993_s25, 1 }
 0x33e   : > { %s699_s3 = sshll.u32 (!%p698_p4), %s989_s24, 8 }
 0x33f   : > { %530 = sbr.rel (%p698_p4) target bundleno = 967 (0x3c7), region = 60  ;;  %s532_s7 = sshra.s32 (!%p698_p4), %s699_s3, 7 }
 0x340   : > { %s700_s21 = sshll.u32 (!%p698_p4), %s532_s7, 2 }
 0x341   : > { %s535_s6 = scalar_lea.vmem (!%p698_p4), [#allocation2], %s700_s21 }
 0x344   : > { %v537_v40 = vld [vmem:[#allocation4] sm:$0xf]  ;;  %v1020_v41 = vmov 0   ;;  %v1021_v42 = vmov 839922192   ;;  %v545_v44 = vlaneseq  ;;  %v536_v49 = vld [vmem:[%s535_s6] sm:$0xff] }
 0x345   : > { %850 = vset.pattern.permute.xlu0 %v1020_v41  ;;  %v543_v43 = vunpack.c.l.s4 %v1021_v42 }
 0x346   : > { %540 = vperm.xlu0 %850, %v537_v40   ;;  %v546_v46 = vshrl.u32 %v545_v44, 7 }
 0x347   : > { %v544_v45 = vunpack.c.0.s8 %v543_v43 }
 0x349   : > { %v547_v47 = vsub.s32 %v544_v45, %v546_v46 }
 0x3c1   : > { %v541_v48 = vpop.permute.xlu0 %540 }
 0x3c2   : > { %v548_v50 = vrot.slane %v541_v48, %v547_v47 }
 0x3c4   : > { %v550_v51 = vmul.f32 %v548_v50, %v536_v49 }
 0x3c6   : > { %551 = vst [vmem:[%s285_s17] sm:$0xff] %v550_v51 }
 0x3c7 PF: > { %s1254_s8 = scalar_lea.sflag [#allocation7], %s283_s28  ;;  %559 = sbr.rel (!%p1172_p0) target bundleno = 1000 (0x3e8), region = 64 }
 0x3c8   : > { %s560_s9 = smul.u32 (%p1172_p0), %s989_s24, %s993_s25 }
 0x3ca   : > { %s702_s11 = sshll.u32 (%p1172_p0), %s560_s9, 1 }
 0x3cb   : > { %s562_s27 = ssub.s32 (%p1172_p0), 5, %s702_s11 }
 0x3cc   : > { %p563_p6 = scmp.lt.s32.totalorder %s562_s27, 2 }
 0x3ce   : > { %s1397_s27 = smov (!%p563_p6, %s562_s27), 2 }
 0x3cf   : > { %s1260_s12 = sshll.u32 %s1397_s27, 6 }
 0x3d0   : > { %s567_s5 = ssub.s32 128, %s1260_s12 }
 0x3d1   : > { %568 = vsyncadd %s1254_s8, %s567_s5  ;;  %s1366_s14 = sld [smem:[#allocation11_spill]]  ;;  %p704_p0 = scmp.ne.s32.totalorder %s1260_s12, 0 }
 0x3d2   : > { %s576_s28 = sshll.u32 %s285_s17, 4  ;;  %s1367_s3 = sld [smem:[#allocation20_spill]]  ;;  %s577_s28 = int_to_ptr.vmem [resolvable:$true] %s576_s28 }
 0x3d3   : > { %s877_s21 = scalar_lea.vmem %s577_s28, %s1260_s12  ;;  %s1022_s6 = smov [#allocation8]  }
 0x3d4   : > { %p878_p7 = scmp.ne.s32.totalorder %s577_s28, %s877_s21  ;;  %s881_s9 = sshll.u32 %s1022_s6, 4  ;;  %s882_s9 = int_to_ptr.vmem [resolvable:$false] %s881_s9 }
 0x3d5   : > { %s883_s27 = scalar_lea.vmem %s882_s9, 256  ;;  %p884_p11 = scmp.lt.s32.totalorder %s577_s28, %s882_s9 }
 0x3d6   : > { %p879_p9 = pnand %p878_p7, %p704_p0  ;;  %p885_p5 = scmp.lt.s32.totalorder %s883_s27, %s877_s21 }
 0x3d7   : > { %s725_s13 = smul.u32 5, %s1366_s14 }
 0x3d8   : > { %p880_p10 = pneg %p879_p9  ;;  %p886_p12 = por %p885_p5, %p884_p11 }
 0x3d9   : > { %s571_s26 = sadd.s32 %s725_s13, %s702_s11 }
 0x3da   : > { %s705_s24 = sshll.u32 %s571_s26, 6  ;;  %p887_p13 = pnand %p886_p12, %p880_p10 }
 0x3db   : > { %s573_s7 = scalar_lea.hbm %s1367_s3, %s705_s24 }
 0x3dc   : > { %890 = shalt.err (!%p887_p13)
}
 0x3dd   : > { %s891_s4 = scalar_lea.hbm %s573_s7, %s1260_s12  ;;  %s895_s5 = scalar_lea.hbm %s1367_s3, 640 }
 0x3de   : > { %p892_p8 = scmp.ne.s32.totalorder %s573_s7, %s891_s4  ;;  %p896_p4 = scmp.lt.s32.totalorder %s573_s7, %s1367_s3 }
 0x3df   : > { %p897_p6 = scmp.lt.s32.totalorder %s895_s5, %s891_s4 }
 0x3e0   : > { %p893_p1 = pnand %p892_p8, %p704_p0 }
 0x3e1   : > { %p898_p7 = por %p897_p6, %p896_p4 }
 0x3e2   : > { %p894_p3 = pneg %p893_p1 }
 0x3e4   : > { %p899_p9 = pnand %p898_p7, %p894_p3 }
 0x3e6   : > { %902 = shalt.err (!%p899_p9)
}
 0x3e7   : > { %579 = dma.vmem_to_hbm [thread:$0]  (%p704_p0), %s577_s28, %s1260_s12, %s573_s7, %s1254_s8  }
 0x3e8 PF: > { %p732_p10 = scmp.ge.s32.totalorder %s1013_s30, 2  ;;  %s588_s26 = sand.u32 1, %s965_s18  }
 0x3e9   : > { %s589_s24 = scalar_lea.sflag [#allocation7], %s588_s26 }
 0x3ea   : > { %p729_p11 = pnand %p732_p10, %p1181_p2 }
 0x3ec   : > { %p730_p5 = pneg %p729_p11 }
 0x3ee   : > { %960 = dma.done.wait (%p730_p5), %s589_s24, 128  }
 0x3ef   : > { %962 = vsyncadd (%p730_p5), %s589_s24, 4294967168  ;;  %s21_s30 = sadd.s32 1, %s1013_s30   ;;  %s1369_s24 = sld [smem:[#allocation12_spill]] }
 0x3f0   : > { %p1292_p12 = scmp.ge.s32.totalorder %s21_s30, 14   ;;  %s1370_s8 = sld [smem:[#allocation13_spill]] }
 0x3f1   : > { %s1371_s27 = sld [smem:[#allocation14_spill]]  ;;  %s1375_s18 = smov %s969_s19 }
 0x3f2   : > { %s1372_s28 = sld [smem:[#allocation15_spill]]  ;;  %s1376_s19 = smov %s973_s20 }
 0x3f3   : > { %s1373_s16 = sld [smem:[#allocation16_spill]]  ;;  %s1377_s20 = smov %s1179_s10 }
 0x3f4   : > { %s1378_s21 = smov %s981_s22  ;;  %s1379_s22 = smov %s985_s23 }
 0x3f5   : > { %s1380_s23 = smov %s1164_s1  ;;  %s1382_s26 = smov %s1009_s29 }
 0x3f6   : > { %s1381_s25 = smov %s1370_s8  ;;  %20 = sbr.rel (!%p1292_p12) target bundleno = 15 (0xf), region = 103 }
 0x3f9   : > { %s1383_s29 = smov %s1373_s16 }
 0x3fb   :  { %594 = vsyncpa [#allocation6], 1 }
 0x3fc   :  { %596 = vsyncpa [#allocation6 + $0x1], 1 }
 0x3fd   :  { %597 = vsyncpa [#allocation7], 1 }
 0x3fe   :  { %599 = vsyncpa [#allocation7 + $0x1], 1 }

</bundles_post_ra>
